<compile_context>
chip_gen: v6e
topology: v6e:2x2x1
jax: 0.10.0
libtpu: 0.0.40
codegen_flags: <defaults>
</compile_context>

<pallas_src>
import functools
import math

import jax
import jax.numpy as jnp
from jax.experimental import pallas as pl
from jax.experimental.pallas import tpu as pltpu


_INV_SQRT2 = 1.0 / math.sqrt(2.0)


def _round_up(v, m):
    return ((v + m - 1) // m) * m


@functools.lru_cache(maxsize=1)
def _vmem_capacity_bytes():
    """Physical per-TensorCore VMEM; conservative fallback if unqueryable."""
    try:
        cap = int(pltpu.get_tpu_info().vmem_capacity_bytes)
        if cap > 0:
            return cap
    except Exception:
        pass
    return 64 << 20  # v7x per-TC size; safe lower bound for v5e/v6e as well.


def _gelu_erf(h):
    # nn.GELU() default is the exact erf formulation; keep it in fp32
    # (important on v5e where there is no bf16 VPU/EUP path).
    return 0.5 * h * (1.0 + jax.lax.erf(h * jnp.float32(_INV_SQRT2)))


# ---------------------------------------------------------------------------
# Kernel bodies
# ---------------------------------------------------------------------------

def _mlp_kernel_resident(x_ref, w1_ref, b1_ref, w2_ref, b2_ref, o_ref):
    """One row tile of tokens; W1/W2 fully resident in VMEM.

    Matmuls run on the MXU with fp32 accumulation; bias add and GELU stay in
    fp32 on the VPU. Dropout(p=0.0) is the identity and is omitted.
    """
    h = jnp.dot(x_ref[...], w1_ref[...], preferred_element_type=jnp.float32)
    h = _gelu_erf(h + b1_ref[...].astype(jnp.float32))
    o = jnp.dot(h.astype(w2_ref.dtype), w2_ref[...],
                preferred_element_type=jnp.float32)
    o_ref[...] = (o + b2_ref[...].astype(jnp.float32)).astype(o_ref.dtype)


def _mlp_kernel_htiled(x_ref, w1_ref, b1_ref, w2_ref, b2_ref, o_ref, acc_ref):
    """Hidden-dim streamed variant: W1/W2 arrive in H-slabs, fc2 accumulates
    into an fp32 VMEM scratch, finalized (+bias, cast) on the last H step."""
    j = pl.program_id(1)

    @pl.when(j == 0)
    def _():
        acc_ref[...] = jnp.zeros_like(acc_ref)

    h = jnp.dot(x_ref[...], w1_ref[...], preferred_element_type=jnp.float32)
    h = _gelu_erf(h + b1_ref[...].astype(jnp.float32))
    acc_ref[...] += jnp.dot(h.astype(w2_ref.dtype), w2_ref[...],
                            preferred_element_type=jnp.float32)

    @pl.when(j == pl.num_programs(1) - 1)
    def _():
        o_ref[...] = (acc_ref[...]
                      + b2_ref[...].astype(jnp.float32)).astype(o_ref.dtype)


# ---------------------------------------------------------------------------
# pallas_call wrapper
# ---------------------------------------------------------------------------

@functools.partial(
    jax.jit,
    static_argnames=("block_m", "h_block", "single_buffer_weights",
                     "out_dtype"))
def _mlp_pallas_impl(x, w1, b1, w2, b2, *, block_m, h_block,
                     single_buffer_weights, out_dtype):
    """x: [M, D_in]; w1: [D_in, H]; b1: [H]; w2: [H, D_out]; b2: [D_out]."""
    M, D_in = x.shape
    H = w1.shape[1]
    D_out = w2.shape[1]

    x_item = jnp.dtype(x.dtype).itemsize
    w_item = jnp.dtype(w1.dtype).itemsize
    o_item = jnp.dtype(out_dtype).itemsize

    # Balanced row tile: minimize tail padding; sublane granule 8 for 32-bit
    # operands, 16 for 16-bit (packed sublanes).
    granule = 8 if x_item >= 4 else 16
    n_row_tiles = max(1, pl.cdiv(M, block_m))
    bm = min(_round_up(max(1, pl.cdiv(M, n_row_tiles)), granule),
             _round_up(block_m, granule))
    grid_m = pl.cdiv(M, bm)   # partial last block -> masked reads/writes.

    b1_2d = b1.reshape(1, H)
    b2_2d = b2.reshape(1, D_out)

    # VMEM accounting. wfac=2 when weights fall back to default (2-deep)
    # pipelining; capacity-aware cap (v7x: 64 MiB/TC -> ~56 MiB usable).
    wfac = 1 if single_buffer_weights else 2
    hard_cap = max(16 << 20, _vmem_capacity_bytes() - (8 << 20))
    budget = int(hard_cap * 0.85)

    def resident_bytes():
        return (2 * bm * D_in * x_item + 2 * bm * D_out * o_item
                + wfac * (D_in * H + H * D_out + H + D_out) * w_item
                + bm * (H + D_out) * 4)                 # fp32 h / o temps

    def streamed_bytes(th):
        return (2 * bm * D_in * x_item + 2 * bm * D_out * o_item
                + 2 * (D_in * th + th * D_out + th) * w_item  # streamed slabs
                + wfac * D_out * w_item
                + bm * th * 4 + bm * D_out * 4)         # fp32 h temp + acc

    # Hidden-dim tiling decision: keep weights resident when they fit,
    # otherwise stream W over H-slabs (keeps the kernel MXU-bound; HBM hides
    # the per-row-tile weight refetch).
    th = None
    if h_block is not None:
        if h_block < H:
            assert H % h_block == 0, "h_block must divide the hidden dim"
            th = h_block
    elif resident_bytes() > budget:
        cands = [t for t in range(128, H, 128) if H % t == 0]
        fitting = [t for t in cands if streamed_bytes(t) <= budget]
        if fitting:
            th = max(fitting)
        elif cands:
            th = min(cands)   # best effort
        # TODO(synk): if H is not a multiple of 128 and resident weights
        # overflow VMEM, we fall back to the resident path (compiler-limited).

    # Resident operands: constant index_map -> fetched once; single buffer.
    weight_kwargs = {}
    if single_buffer_weights and hasattr(pl, "Buffered"):
        weight_kwargs = dict(pipeline_mode=pl.Buffered(1))

    flops = 2 * grid_m * bm * (D_in * H + H * D_out)
    bytes_accessed = (M * D_in * x_item + M * D_out * o_item
                      + (D_in * H + H * D_out + H + D_out) * w_item)
    cost = pl.CostEstimate(flops=flops, transcendentals=grid_m * bm * H,
                           bytes_accessed=bytes_accessed)

    if th is None:
        vmem_limit = int(min(max(int(resident_bytes() * 1.25) + (4 << 20),
                                 16 << 20), hard_cap))
        return pl.pallas_call(
            _mlp_kernel_resident,
            out_shape=jax.ShapeDtypeStruct((M, D_out), out_dtype),
            grid_spec=pltpu.PrefetchScalarGridSpec(
                num_scalar_prefetch=0,
                grid=(grid_m,),
                in_specs=[
                    pl.BlockSpec((bm, D_in), lambda i: (i, 0)),                  # x
                    pl.BlockSpec((D_in, H), lambda i: (0, 0), **weight_kwargs),  # W1
                    pl.BlockSpec((1, H), lambda i: (0, 0), **weight_kwargs),     # b1
                    pl.BlockSpec((H, D_out), lambda i: (0, 0), **weight_kwargs), # W2
                    pl.BlockSpec((1, D_out), lambda i: (0, 0), **weight_kwargs), # b2
                ],
                out_specs=pl.BlockSpec((bm, D_out), lambda i: (i, 0)),
            ),
            compiler_params=pltpu.CompilerParams(
                dimension_semantics=("parallel",),
                vmem_limit_bytes=vmem_limit,
            ),
            cost_estimate=cost,
        )(x, w1, b1_2d, w2, b2_2d)

    # H-streamed path (large weights / small VMEM, e.g. fp32 ViT-L/H on v7x).
    vmem_limit = int(min(max(int(streamed_bytes(th) * 1.25) + (4 << 20),
                             16 << 20), hard_cap))
    return pl.pallas_call(
        _mlp_kernel_htiled,
        out_shape=jax.ShapeDtypeStruct((M, D_out), out_dtype),
        grid_spec=pltpu.PrefetchScalarGridSpec(
            num_scalar_prefetch=0,
            grid=(grid_m, H // th),
            in_specs=[
                pl.BlockSpec((bm, D_in), lambda i, j: (i, 0)),                   # x
                pl.BlockSpec((D_in, th), lambda i, j: (0, j)),                   # W1 slab
                pl.BlockSpec((1, th), lambda i, j: (0, j)),                      # b1 slab
                pl.BlockSpec((th, D_out), lambda i, j: (j, 0)),                  # W2 slab
                pl.BlockSpec((1, D_out), lambda i, j: (0, 0), **weight_kwargs),  # b2
            ],
            out_specs=pl.BlockSpec((bm, D_out), lambda i, j: (i, 0)),
            scratch_shapes=[pltpu.VMEM((bm, D_out), jnp.float32)],
        ),
        compiler_params=pltpu.CompilerParams(
            dimension_semantics=("parallel", "arbitrary"),
            vmem_limit_bytes=vmem_limit,
        ),
        cost_estimate=cost,
    )(x, w1, b1_2d, w2, b2_2d)


def mlp_pallas(x, w1, b1, w2, b2, *, block_m=256, compute_dtype=jnp.bfloat16,
               h_block=None):
    """ViT MLP forward: fc2(GELU(fc1(x))). x: [..., D_in] -> [..., D_out].

    compute_dtype controls matmul *operand* precision (bf16 by default: full
    MXU rate on v5e/v6e/v7x and halved resident-weight VMEM). Accumulation,
    bias add and GELU remain fp32 in-kernel and the output is written in the
    caller's original dtype. Pass compute_dtype=None to keep input precision.
    h_block=None selects the weight-resident vs H-streamed path automatically.
    """
    orig_shape = x.shape
    orig_dtype = x.dtype
    D_in = orig_shape[-1]
    D_out = w2.shape[1]
    x2d = x.reshape(-1, D_in)
    if compute_dtype is not None:
        x2d = x2d.astype(compute_dtype)
        w1 = w1.astype(compute_dtype)
        w2 = w2.astype(compute_dtype)
    kwargs = dict(block_m=block_m, h_block=h_block, out_dtype=orig_dtype)
    try:
        out2d = _mlp_pallas_impl(x2d, w1, b1, w2, b2,
                                 single_buffer_weights=True, **kwargs)
    except Exception:
        # Fallback for Pallas builds without BlockSpec(pipeline_mode=Buffered(1)).
        out2d = _mlp_pallas_impl(x2d, w1, b1, w2, b2,
                                 single_buffer_weights=False, **kwargs)
    return out2d.reshape(orig_shape[:-1] + (D_out,))


def mlp_reference(x, w1, b1, w2, b2):
    hp = jax.lax.Precision.HIGHEST
    h = jnp.dot(x, w1, precision=hp) + b1
    h = jax.nn.gelu(h, approximate=False)
    return jnp.dot(h, w2, precision=hp) + b2


if __name__ == "__main__":
    # Small shapes consistent with the module; lane-aligned feature dims so
    # the output tile is lane-dense (D_out multiple of 128).
    B, N, D_in = 2, 8, 128
    H = 256
    D_out = D_in

    key = jax.random.PRNGKey(0)
    kx, kw1, kb1, kw2, kb2, kx2 = jax.random.split(key, 6)

    # PyTorch-Linear-style init: U(-1/sqrt(fan_in), 1/sqrt(fan_in)).
    lim1 = 1.0 / math.sqrt(D_in)
    lim2 = 1.0 / math.sqrt(H)
    w1 = jax.random.uniform(kw1, (D_in, H), jnp.float32, -lim1, lim1)
    b1 = jax.random.uniform(kb1, (H,), jnp.float32, -lim1, lim1)
    w2 = jax.random.uniform(kw2, (H, D_out), jnp.float32, -lim2, lim2)
    b2 = jax.random.uniform(kb2, (D_out,), jnp.float32, -lim2, lim2)

    x = jax.random.normal(kx, (B, N, D_in), jnp.float32)
    ref = mlp_reference(x.reshape(-1, D_in), w1, b1, w2, b2).reshape(B, N, D_out)

    # 1) fp32-operand, weight-resident path (tight tolerance).
    out_fp32 = mlp_pallas(x, w1, b1, w2, b2, compute_dtype=jnp.float32)
    jax.block_until_ready(out_fp32)
    assert out_fp32.shape == (B, N, D_out)
    assert jnp.allclose(out_fp32, ref, atol=2e-4, rtol=2e-4), "fp32 mismatch"

    # 2) default bf16-operand path (fp32 accumulation); output keeps x dtype.
    out_def = mlp_pallas(x, w1, b1, w2, b2)
    jax.block_until_ready(out_def)
    assert out_def.dtype == x.dtype
    assert jnp.allclose(out_def, ref, atol=5e-2, rtol=5e-2), "bf16 mismatch"

    # 3) non-divisible M: partial last row tile via cdiv grid (no host pad).
    x_odd = jax.random.normal(kx2, (1, 200, D_in), jnp.float32)
    out_odd = mlp_pallas(x_odd, w1, b1, w2, b2, block_m=128,
                         compute_dtype=jnp.float32)
    jax.block_until_ready(out_odd)
    ref_odd = mlp_reference(x_odd.reshape(-1, D_in), w1, b1, w2, b2)
    assert jnp.allclose(out_odd.reshape(-1, D_out), ref_odd,
                        atol=2e-4, rtol=2e-4), "partial-block mismatch"

    # 4) forced hidden-dim streamed (accumulator) path.
    out_ht = mlp_pallas(x, w1, b1, w2, b2, compute_dtype=jnp.float32,
                        h_block=128)
    jax.block_until_ready(out_ht)
    assert jnp.allclose(out_ht, ref, atol=2e-4, rtol=2e-4), "H-tiled mismatch"

    print("KERNEL_OK")
</pallas_src>

<mosaic_0001>
module attributes {stable_mosaic.version = 11 : i64} {
  func.func @_mlp_kernel_resident(%arg0: i32, %arg1: memref<16x128xf32, #tpu.memory_space<vmem>>, %arg2: memref<128x256xf32, #tpu.memory_space<vmem>>, %arg3: memref<1x256xf32, #tpu.memory_space<vmem>>, %arg4: memref<256x128xf32, #tpu.memory_space<vmem>>, %arg5: memref<1x128xf32, #tpu.memory_space<vmem>>, %arg6: memref<16x128xf32, #tpu.memory_space<vmem>>) attributes {dimension_semantics = [#tpu.dimension_semantics<parallel>], iteration_bounds = array<i64: 1>, scalar_prefetch = 0 : i64, scratch_operands = 0 : i64, tpu.core_type = #tpu.core_type<tc>, window_params = [{transform_indices = @transform_0, window_bounds = array<i64: 16, 128>}, {pipeline_mode = #tpu.pipeline_mode<synchronous>, transform_indices = @transform_1, window_bounds = array<i64: 128, 256>}, {pipeline_mode = #tpu.pipeline_mode<synchronous>, transform_indices = @transform_2, window_bounds = array<i64: 1, 256>}, {pipeline_mode = #tpu.pipeline_mode<synchronous>, transform_indices = @transform_3, window_bounds = array<i64: 256, 128>}, {pipeline_mode = #tpu.pipeline_mode<synchronous>, transform_indices = @transform_4, window_bounds = array<i64: 1, 128>}, {transform_indices = @transform_5, window_bounds = array<i64: 16, 128>}]} {
    %c0 = arith.constant 0 : index
    %c0_0 = arith.constant 0 : index
    %0 = vector.load %arg1[%c0, %c0_0] : memref<16x128xf32, #tpu.memory_space<vmem>>, vector<16x128xf32>
    %c0_1 = arith.constant 0 : index
    %c0_2 = arith.constant 0 : index
    %1 = vector.load %arg2[%c0_1, %c0_2] : memref<128x256xf32, #tpu.memory_space<vmem>>, vector<128x256xf32>
    %cst = arith.constant dense<0.000000e+00> : vector<16x256xf32>
    %2 = tpu.matmul %0, %1, %cst {dimension_numbers = #tpu.dot_dimension_numbers<[1], [0], [0], [1], [0, 0, 1, 1], [], []>} : vector<16x128xf32>, vector<128x256xf32>, vector<16x256xf32> -> vector<16x256xf32>
    %c0_3 = arith.constant 0 : index
    %c0_4 = arith.constant 0 : index
    %3 = vector.load %arg3[%c0_3, %c0_4] : memref<1x256xf32, #tpu.memory_space<vmem>>, vector<1x256xf32>
    %4 = vector.broadcast %3 : vector<1x256xf32> to vector<16x256xf32>
    %5 = arith.addf %2, %4 : vector<16x256xf32>
    %cst_5 = arith.constant 5.000000e-01 : f32
    %6 = vector.broadcast %cst_5 : f32 to vector<16x256xf32>
    %7 = arith.mulf %6, %5 : vector<16x256xf32>
    %cst_6 = arith.constant 0.707106769 : f32
    %8 = vector.broadcast %cst_6 : f32 to vector<16x256xf32>
    %9 = arith.mulf %5, %8 : vector<16x256xf32>
    %10 = math.erf %9 : vector<16x256xf32>
    %cst_7 = arith.constant 1.000000e+00 : f32
    %11 = vector.broadcast %cst_7 : f32 to vector<16x256xf32>
    %12 = arith.addf %11, %10 : vector<16x256xf32>
    %13 = arith.mulf %7, %12 : vector<16x256xf32>
    %c0_8 = arith.constant 0 : index
    %c0_9 = arith.constant 0 : index
    %14 = vector.load %arg4[%c0_8, %c0_9] : memref<256x128xf32, #tpu.memory_space<vmem>>, vector<256x128xf32>
    %cst_10 = arith.constant dense<0.000000e+00> : vector<16x128xf32>
    %15 = tpu.matmul %13, %14, %cst_10 {dimension_numbers = #tpu.dot_dimension_numbers<[1], [0], [0], [1], [0, 0, 1, 1], [], []>} : vector<16x256xf32>, vector<256x128xf32>, vector<16x128xf32> -> vector<16x128xf32>
    %c0_11 = arith.constant 0 : index
    %c0_12 = arith.constant 0 : index
    %16 = vector.load %arg5[%c0_11, %c0_12] : memref<1x128xf32, #tpu.memory_space<vmem>>, vector<1x128xf32>
    %17 = vector.broadcast %16 : vector<1x128xf32> to vector<16x128xf32>
    %18 = arith.addf %15, %17 : vector<16x128xf32>
    %c0_13 = arith.constant 0 : index
    %c0_14 = arith.constant 0 : index
    %19 = vector.load %arg6[%c0_13, %c0_14] : memref<16x128xf32, #tpu.memory_space<vmem>>, vector<16x128xf32>
    tpu.vector_store %arg6[%c0_13, %c0_14], %18 {strides = array<i32>} : memref<16x128xf32, #tpu.memory_space<vmem>>, vector<16x128xf32>,
    return
  }
  func.func @transform_0(%arg0: i32) -> (i32, i32) {
    %c0_i32 = arith.constant 0 : i32
    %c0_i32_0 = arith.constant 0 : i32
    return %arg0, %c0_i32 : i32, i32
  }
  func.func @transform_1(%arg0: i32) -> (i32, i32) {
    %c0_i32 = arith.constant 0 : i32
    %c0_i32_0 = arith.constant 0 : i32
    %c0_i32_1 = arith.constant 0 : i32
    return %c0_i32, %c0_i32_0 : i32, i32
  }
  func.func @transform_2(%arg0: i32) -> (i32, i32) {
    %c0_i32 = arith.constant 0 : i32
    %c0_i32_0 = arith.constant 0 : i32
    %c0_i32_1 = arith.constant 0 : i32
    return %c0_i32, %c0_i32_0 : i32, i32
  }
  func.func @transform_3(%arg0: i32) -> (i32, i32) {
    %c0_i32 = arith.constant 0 : i32
    %c0_i32_0 = arith.constant 0 : i32
    %c0_i32_1 = arith.constant 0 : i32
    return %c0_i32, %c0_i32_0 : i32, i32
  }
  func.func @transform_4(%arg0: i32) -> (i32, i32) {
    %c0_i32 = arith.constant 0 : i32
    %c0_i32_0 = arith.constant 0 : i32
    %c0_i32_1 = arith.constant 0 : i32
    return %c0_i32, %c0_i32_0 : i32, i32
  }
  func.func @transform_5(%arg0: i32) -> (i32, i32) {
    %c0_i32 = arith.constant 0 : i32
    %c0_i32_0 = arith.constant 0 : i32
    return %arg0, %c0_i32 : i32, i32
  }
}

module attributes {stable_mosaic.version = 11 : i64} {
  func.func @_mlp_kernel_resident(%arg0: i32, %arg1: memref<16x128xf32, #tpu.memory_space<vmem>>, %arg2: memref<128x256xf32, #tpu.memory_space<vmem>>, %arg3: memref<1x256xf32, #tpu.memory_space<vmem>>, %arg4: memref<256x128xf32, #tpu.memory_space<vmem>>, %arg5: memref<1x128xf32, #tpu.memory_space<vmem>>, %arg6: memref<16x128xf32, #tpu.memory_space<vmem>>) attributes {dimension_semantics = [#tpu.dimension_semantics<parallel>], iteration_bounds = array<i64: 1>, scalar_prefetch = 0 : i64, scratch_operands = 0 : i64, tpu.core_type = #tpu.core_type<tc>, window_params = [{transform_indices = @transform_0, window_bounds = array<i64: 16, 128>}, {pipeline_mode = #tpu.pipeline_mode<synchronous>, transform_indices = @transform_1, window_bounds = array<i64: 128, 256>}, {pipeline_mode = #tpu.pipeline_mode<synchronous>, transform_indices = @transform_2, window_bounds = array<i64: 1, 256>}, {pipeline_mode = #tpu.pipeline_mode<synchronous>, transform_indices = @transform_3, window_bounds = array<i64: 256, 128>}, {pipeline_mode = #tpu.pipeline_mode<synchronous>, transform_indices = @transform_4, window_bounds = array<i64: 1, 128>}, {transform_indices = @transform_5, window_bounds = array<i64: 16, 128>}]} {
    %c0 = arith.constant 0 : index
    %c0_0 = arith.constant 0 : index
    %0 = vector.load %arg1[%c0, %c0_0] : memref<16x128xf32, #tpu.memory_space<vmem>>, vector<16x128xf32>
    %c0_1 = arith.constant 0 : index
    %c0_2 = arith.constant 0 : index
    %1 = vector.load %arg2[%c0_1, %c0_2] : memref<128x256xf32, #tpu.memory_space<vmem>>, vector<128x256xf32>
    %cst = arith.constant dense<0.000000e+00> : vector<16x256xf32>
    %2 = tpu.matmul %0, %1, %cst {dimension_numbers = #tpu.dot_dimension_numbers<[1], [0], [0], [1], [0, 0, 1, 1], [], []>} : vector<16x128xf32>, vector<128x256xf32>, vector<16x256xf32> -> vector<16x256xf32>
    %c0_3 = arith.constant 0 : index
    %c0_4 = arith.constant 0 : index
    %3 = vector.load %arg3[%c0_3, %c0_4] : memref<1x256xf32, #tpu.memory_space<vmem>>, vector<1x256xf32>
    %4 = vector.broadcast %3 : vector<1x256xf32> to vector<16x256xf32>
    %5 = arith.addf %2, %4 : vector<16x256xf32>
    %cst_5 = arith.constant 5.000000e-01 : f32
    %6 = vector.broadcast %cst_5 : f32 to vector<16x256xf32>
    %7 = arith.mulf %6, %5 : vector<16x256xf32>
    %cst_6 = arith.constant 0.707106769 : f32
    %8 = vector.broadcast %cst_6 : f32 to vector<16x256xf32>
    %9 = arith.mulf %5, %8 : vector<16x256xf32>
    %10 = math.erf %9 : vector<16x256xf32>
    %cst_7 = arith.constant 1.000000e+00 : f32
    %11 = vector.broadcast %cst_7 : f32 to vector<16x256xf32>
    %12 = arith.addf %11, %10 : vector<16x256xf32>
    %13 = arith.mulf %7, %12 : vector<16x256xf32>
    %c0_8 = arith.constant 0 : index
    %c0_9 = arith.constant 0 : index
    %14 = vector.load %arg4[%c0_8, %c0_9] : memref<256x128xf32, #tpu.memory_space<vmem>>, vector<256x128xf32>
    %cst_10 = arith.constant dense<0.000000e+00> : vector<16x128xf32>
    %15 = tpu.matmul %13, %14, %cst_10 {dimension_numbers = #tpu.dot_dimension_numbers<[1], [0], [0], [1], [0, 0, 1, 1], [], []>} : vector<16x256xf32>, vector<256x128xf32>, vector<16x128xf32> -> vector<16x128xf32>
    %c0_11 = arith.constant 0 : index
    %c0_12 = arith.constant 0 : index
    %16 = vector.load %arg5[%c0_11, %c0_12] : memref<1x128xf32, #tpu.memory_space<vmem>>, vector<1x128xf32>
    %17 = vector.broadcast %16 : vector<1x128xf32> to vector<16x128xf32>
    %18 = arith.addf %15, %17 : vector<16x128xf32>
    %c0_13 = arith.constant 0 : index
    %c0_14 = arith.constant 0 : index
    %19 = vector.load %arg6[%c0_13, %c0_14] : memref<16x128xf32, #tpu.memory_space<vmem>>, vector<16x128xf32>
    tpu.vector_store %arg6[%c0_13, %c0_14], %18 {strides = array<i32>} : memref<16x128xf32, #tpu.memory_space<vmem>>, vector<16x128xf32>,
    return
  }
  func.func @transform_0(%arg0: i32) -> (i32, i32) {
    %c0_i32 = arith.constant 0 : i32
    %c0_i32_0 = arith.constant 0 : i32
    return %arg0, %c0_i32 : i32, i32
  }
  func.func @transform_1(%arg0: i32) -> (i32, i32) {
    %c0_i32 = arith.constant 0 : i32
    %c0_i32_0 = arith.constant 0 : i32
    %c0_i32_1 = arith.constant 0 : i32
    return %c0_i32, %c0_i32_0 : i32, i32
  }
  func.func @transform_2(%arg0: i32) -> (i32, i32) {
    %c0_i32 = arith.constant 0 : i32
    %c0_i32_0 = arith.constant 0 : i32
    %c0_i32_1 = arith.constant 0 : i32
    return %c0_i32, %c0_i32_0 : i32, i32
  }
  func.func @transform_3(%arg0: i32) -> (i32, i32) {
    %c0_i32 = arith.constant 0 : i32
    %c0_i32_0 = arith.constant 0 : i32
    %c0_i32_1 = arith.constant 0 : i32
    return %c0_i32, %c0_i32_0 : i32, i32
  }
  func.func @transform_4(%arg0: i32) -> (i32, i32) {
    %c0_i32 = arith.constant 0 : i32
    %c0_i32_0 = arith.constant 0 : i32
    %c0_i32_1 = arith.constant 0 : i32
    return %c0_i32, %c0_i32_0 : i32, i32
  }
  func.func @transform_5(%arg0: i32) -> (i32, i32) {
    %c0_i32 = arith.constant 0 : i32
    %c0_i32_0 = arith.constant 0 : i32
    return %arg0, %c0_i32 : i32, i32
  }
}

</mosaic_0001>

<bundles_post_ra>
// kernel: _mlp_pallas_impl.1
= control target key start
LH: loop header
LB: loop body
LE: loop exit
PB: predicated region body
PF: predicated region fallthrough
CT: control target
= control target key end

     0   :  { %10 = vsyncpa [#allocation3], 0  ;;  %s549_s0 = inlined_call_operand.hbm [shape: f32[16,128], index: 0, kind: input, shape index: {}]   ;;  %s550_s1 = inlined_call_operand.hbm [shape: f32[128,256], index: 1, kind: input, shape index: {}]   ;;  %s551_s2 = inlined_call_operand.vmem [shape: f32[1,256], index: 2, kind: input, shape index: {}]   ;;  %s552_s3 = inlined_call_operand.hbm [shape: f32[256,128], index: 3, kind: input, shape index: {}]   ;;  %s553_s4 = inlined_call_operand.vmem [shape: f32[1,128], index: 4, kind: input, shape index: {}]   ;;  %s554_s5 = inlined_call_operand.hbm [shape: f32[16,128], index: 5, kind: output, shape index: {}]  }
   0x1   :  { %11 = vsyncpa [#allocation6], 0 }
   0x2   :  { %12 = vsyncpa [#allocation4], 0  ;;  %s481_s18 = smov [#allocation5]  }
   0x3   :  { %s30_s19 = sshll.u32 %s481_s18, 4  ;;  %s31_s19 = int_to_ptr.vmem [resolvable:$true] %s30_s19 }
   0x4   :  { %s403_s20 = scalar_lea.vmem %s31_s19, 4096  ;;  %p408_p1 = scmp.lt.s32.totalorder %s31_s19, %s31_s19 }
   0x5   :  { %p404_p0 = scmp.ne.s32.totalorder %s31_s19, %s403_s20  ;;  %p409_p2 = scmp.lt.s32.totalorder %s403_s20, %s403_s20 }
   0x7   :  { %p410_p3 = por %p409_p2, %p408_p1 }
   0x9   :  { %p411_p4 = pnand %p410_p3, %p404_p0 }
   0xb   :  { %414 = shalt.err (!%p411_p4)
}
   0xc   :  { %s482_s21 = smov 256   ;;  %s483_s22 = smov 16  }
   0xd   :  { %36 = dma.hbm_to_vmem [thread:$0]  %s550_s1, 4096, %s31_s19, [#allocation6], %s482_s21, %s482_s21, %s483_s22  }
   0xe   :  { %s484_s25 = smov [#allocation2]  }
   0xf   :  { %s18_s26 = sshll.u32 %s484_s25, 4  ;;  %s19_s26 = int_to_ptr.vmem [resolvable:$true] %s18_s26 }
  0x10   :  { %s423_s27 = scalar_lea.vmem %s19_s26, 256  ;;  %p428_p6 = scmp.lt.s32.totalorder %s19_s26, %s19_s26 }
  0x11   :  { %p424_p5 = scmp.ne.s32.totalorder %s19_s26, %s423_s27  ;;  %p429_p7 = scmp.lt.s32.totalorder %s423_s27, %s423_s27 }
  0x13   :  { %p430_p8 = por %p429_p7, %p428_p6 }
  0x15   :  { %p431_p9 = pnand %p430_p8, %p424_p5 }
  0x17   :  { %434 = shalt.err (!%p431_p9)
}
  0x18   :  { %s485_s28 = smov 128   ;;  %s486_s29 = smov 8  }
  0x19   :  { %24 = dma.hbm_to_vmem [thread:$0]  %s549_s0, 256, %s19_s26, [#allocation3], %s485_s28, %s485_s28, %s486_s29  }
  0x1a   :  { %s487_s1 = smov [#allocation7]  }
  0x1b   :  { %s44_s7 = sshll.u32 %s487_s1, 4  ;;  %s45_s7 = int_to_ptr.vmem [resolvable:$true] %s44_s7 }
  0x1c   :  { %s443_s8 = scalar_lea.vmem %s45_s7, 4096  ;;  %p448_p11 = scmp.lt.s32.totalorder %s45_s7, %s45_s7 }
  0x1d   :  { %p444_p10 = scmp.ne.s32.totalorder %s45_s7, %s443_s8  ;;  %p449_p12 = scmp.lt.s32.totalorder %s443_s8, %s443_s8 }
  0x1f   :  { %p450_p13 = por %p449_p12, %p448_p11 }
  0x21   :  { %p451_p0 = pnand %p450_p13, %p444_p10 }
  0x23   :  { %454 = shalt.err (!%p451_p0)
}
  0x24   :  { %50 = dma.hbm_to_vmem [thread:$0]  %s552_s3, 4096, %s45_s7, [#allocation6], %s485_s28, %s485_s28, %s486_s29  }
  0x25   :  { %475 = dma.done.wait [#allocation3], 256  }
  0x26   :  { %476 = vsyncadd [#allocation3], 4294967040 }
  0x27   :  { %477 = dma.done.wait [#allocation6], 8192  }
  0x28   :  { %478 = vsyncadd [#allocation6], 4294959104  ;;  %v488_v0 = vmov 0.0   ;;  %v95_v1 = vld [vmem:[#allocation5 + $0xf8] sm:$0xff]  ;;  %v94_v2 = vld [vmem:[#allocation5 + $0xf0] sm:$0xff]  ;;  %s489_s12 = smov [#allocation8]  }
  0x29   :  { %172 = vmatprep.mubr.f32.mxu0 %v488_v0  ;;  %v93_v3 = vld [vmem:[#allocation5 + $0xe8] sm:$0xff]  ;;  %108 = vmatprep.subr.mxu0 %v95_v1  ;;  %v92_v4 = vld [vmem:[#allocation5 + $0xe0] sm:$0xff]  ;;  %v91_v5 = vld [vmem:[#allocation5 + $0xd8] sm:$0xff]  ;;  %s326_s13 = sshll.u32 %s489_s12, 4  ;;  %s327_s13 = int_to_ptr.vmem [resolvable:$true] %s326_s13 }
  0x2a   :  { %109 = vmatpush1.msra.mxu0 %v94_v2  ;;  %v90_v6 = vld [vmem:[#allocation5 + $0xd0] sm:$0xff]  ;;  %v89_v7 = vld [vmem:[#allocation5 + $0xc8] sm:$0xff]  ;;  %v88_v8 = vld [vmem:[#allocation5 + $0xc0] sm:$0xff]  ;;  %s455_s14 = scalar_lea.vmem %s327_s13, 256  ;;  %p460_p2 = scmp.lt.s32.totalorder %s327_s13, %s327_s13 }
  0x2b   :  { %110 = vmatprep.subr.mxu0 %v93_v3  ;;  %v87_v9 = vld [vmem:[#allocation5 + $0xb8] sm:$0xff]  ;;  %v86_v10 = vld [vmem:[#allocation5 + $0xb0] sm:$0xff]  ;;  %v85_v11 = vld [vmem:[#allocation5 + $0xa8] sm:$0xff]  ;;  %v98_v3 = vlaneseq  ;;  %p456_p1 = scmp.ne.s32.totalorder %s327_s13, %s455_s14  ;;  %p461_p3 = scmp.lt.s32.totalorder %s455_s14, %s455_s14 }
  0x2c   :  { %111 = vmatpush1.msra.mxu0 %v92_v4  ;;  %v84_v12 = vld [vmem:[#allocation5 + $0xa0] sm:$0xff]  ;;  %v83_v13 = vld [vmem:[#allocation5 + $0x98] sm:$0xff]  ;;  %v82_v14 = vld [vmem:[#allocation5 + $0x90] sm:$0xff] }
  0x2d   :  { %112 = vmatprep.subr.mxu0 %v91_v5  ;;  %v236_v15 = vld [vmem:[#allocation7 + $0xf8] sm:$0xff]  ;;  %v81_v17 = vld [vmem:[#allocation5 + $0x88] sm:$0xff]  ;;  %v235_v18 = vld [vmem:[#allocation7 + $0xf0] sm:$0xff]  ;;  %v99_v4 = vshrl.u32 %v98_v3, 7  ;;  %p462_p4 = por %p461_p3, %p460_p2 }
  0x2e   :  { %113 = vmatpush1.msra.mxu0 %v90_v6  ;;  %v220_v16 = vld [vmem:[#allocation7 + $0x78] sm:$0xff]  ;;  %340 = vmatprep.subr.mxu1 %v236_v15  ;;  %v219_v19 = vld [vmem:[#allocation7 + $0x70] sm:$0xff]  ;;  %v80_v20 = vld [vmem:[#allocation5 + $0x80] sm:$0xff] }
  0x2f   :  { %114 = vmatprep.subr.mxu0 %v89_v7  ;;  %341 = vmatpush3.msra.mxu1 %v220_v16  ;;  %v234_v21 = vld [vmem:[#allocation7 + $0xe8] sm:$0xff]  ;;  %v79_v22 = vld [vmem:[#allocation5 + $0x78] sm:$0xff]  ;;  %v78_v24 = vld [vmem:[#allocation5 + $0x70] sm:$0xff]  ;;  %v100_v5 = vsub.s32 0, %v99_v4  ;;  %v104_v7 = vsub.s32 1, %v99_v4  ;;  %p463_p5 = pnand %p462_p4, %p456_p1 }
  0x30   :  { %115 = vmatpush1.msra.mxu0 %v88_v8  ;;  %342 = vmatprep.subr.mxu1 %v235_v18  ;;  %v218_v23 = vld [vmem:[#allocation7 + $0x68] sm:$0xff]  ;;  %v76_v26 = vld [vmem:[#allocation5 + $0x60] sm:$0xff]  ;;  %v75_v27 = vld [vmem:[#allocation5 + $0x58] sm:$0xff] }
  0x31   :  { %116 = vmatprep.subr.mxu0 %v87_v9  ;;  %343 = vmatpush3.msra.mxu1 %v219_v19  ;;  %v77_v25 = vld [vmem:[#allocation5 + $0x68] sm:$0xff]  ;;  %v74_v28 = vld [vmem:[#allocation5 + $0x50] sm:$0xff]  ;;  %v72_v30 = vld [vmem:[#allocation5 + $0x40] sm:$0xff] }
  0x32   :  { %117 = vmatpush1.msra.mxu0 %v86_v10  ;;  %344 = vmatprep.subr.mxu1 %v234_v21  ;;  %v73_v29 = vld [vmem:[#allocation5 + $0x48] sm:$0xff]  ;;  %v71_v31 = vld [vmem:[#allocation5 + $0x38] sm:$0xff]  ;;  %v70_v32 = vld [vmem:[#allocation5 + $0x30] sm:$0xff] }
  0x33   :  { %118 = vmatprep.subr.mxu0 %v85_v11  ;;  %345 = vmatpush3.msra.mxu1 %v218_v23  ;;  %v69_v33 = vld [vmem:[#allocation5 + $0x28] sm:$0xff]  ;;  %v68_v34 = vld [vmem:[#allocation5 + $0x20] sm:$0xff]  ;;  %v67_v35 = vld [vmem:[#allocation5 + $0x18] sm:$0xff] }
  0x34   :  { %119 = vmatpush1.msra.mxu0 %v84_v12  ;;  %v66_v36 = vld [vmem:[#allocation5 + $0x10] sm:$0xff]  ;;  %v65_v37 = vld [vmem:[#allocation5 + $0x8] sm:$0xff]  ;;  %v64_v38 = vld [vmem:[#allocation5] sm:$0xff] }
  0x35   :  { %120 = vmatprep.subr.mxu0 %v83_v13  ;;  %v62_v39 = vld [vmem:[#allocation2] sm:$0xff]  ;;  %v63_v40 = vld [vmem:[#allocation2 + $0x8] sm:$0xff]  ;;  %v233_v41 = vld [vmem:[#allocation7 + $0xe0] sm:$0xff] }
  0x36   :  { %121 = vmatpush1.msra.mxu0 %v82_v14  ;;  %346 = vmatprep.subr.mxu1 %v233_v41  ;;  %v217_v42 = vld [vmem:[#allocation7 + $0x60] sm:$0xff]  ;;  %v232_v43 = vld [vmem:[#allocation7 + $0xd8] sm:$0xff]  ;;  %v231_v45 = vld [vmem:[#allocation7 + $0xd0] sm:$0xff] }
  0x37   :  { %122 = vmatprep.subr.mxu0 %v81_v17  ;;  %347 = vmatpush3.msra.mxu1 %v217_v42  ;;  %v216_v44 = vld [vmem:[#allocation7 + $0x58] sm:$0xff]  ;;  %v215_v46 = vld [vmem:[#allocation7 + $0x50] sm:$0xff]  ;;  %v230_v47 = vld [vmem:[#allocation7 + $0xc8] sm:$0xff] }
  0x38   :  { %123 = vmatpush1.msra.mxu0 %v80_v20  ;;  %348 = vmatprep.subr.mxu1 %v232_v43  ;;  %v214_v48 = vld [vmem:[#allocation7 + $0x48] sm:$0xff]  ;;  %v229_v49 = vld [vmem:[#allocation7 + $0xc0] sm:$0xff]  ;;  %v228_v51 = vld [vmem:[#allocation7 + $0xb8] sm:$0xff] }
  0x39   :  { %124 = vmatprep.subr.mxu0 %v79_v22  ;;  %349 = vmatpush3.msra.mxu1 %v216_v44  ;;  %v213_v50 = vld [vmem:[#allocation7 + $0x40] sm:$0xff]  ;;  %v212_v52 = vld [vmem:[#allocation7 + $0x38] sm:$0xff]  ;;  %v227_v53 = vld [vmem:[#allocation7 + $0xb0] sm:$0xff] }
  0x3a   :  { %125 = vmatpush1.msra.mxu0 %v78_v24  ;;  %350 = vmatprep.subr.mxu1 %v231_v45  ;;  %v211_v54 = vld [vmem:[#allocation7 + $0x30] sm:$0xff]  ;;  %v226_v55 = vld [vmem:[#allocation7 + $0xa8] sm:$0xff]  ;;  %v225_v57 = vld [vmem:[#allocation7 + $0xa0] sm:$0xff] }
  0x3b   :  { %126 = vmatprep.subr.mxu0 %v77_v25  ;;  %351 = vmatpush3.msra.mxu1 %v215_v46  ;;  %v210_v56 = vld [vmem:[#allocation7 + $0x28] sm:$0xff]  ;;  %v209_v58 = vld [vmem:[#allocation7 + $0x20] sm:$0xff]  ;;  %v224_v59 = vld [vmem:[#allocation7 + $0x98] sm:$0xff] }
  0x3c   :  { %127 = vmatpush1.msra.mxu0 %v76_v26  ;;  %352 = vmatprep.subr.mxu1 %v230_v47  ;;  %v208_v60 = vld [vmem:[#allocation7 + $0x18] sm:$0xff]  ;;  %v223_v61 = vld [vmem:[#allocation7 + $0x90] sm:$0xff]  ;;  %v222_v63 = vld [vmem:[#allocation7 + $0x88] sm:$0xff] }
  0x3d   :  { %128 = vmatprep.subr.mxu0 %v75_v27  ;;  %353 = vmatpush3.msra.mxu1 %v214_v48  ;;  %v207_v62 = vld [vmem:[#allocation7 + $0x10] sm:$0xff]  ;;  %v221_v1 = vld [vmem:[#allocation7 + $0x80] sm:$0xff] }
  0x3e   :  { %129 = vmatpush1.msra.mxu0 %v74_v28  ;;  %354 = vmatprep.subr.mxu1 %v229_v49  ;;  %v205_v2 = vld [vmem:[#allocation7] sm:$0xff]  ;;  %v96_v6 = vld [vmem:[%s551_s2] sm:$0x3] }
  0x3f   :  { %130 = vmatprep.subr.mxu0 %v73_v29  ;;  %355 = vmatpush3.msra.mxu1 %v213_v50  ;;  %v101_v8 = vrot.slane %v96_v6, %v100_v5  ;;  %v105_v9 = vrot.slane %v96_v6, %v104_v7 }
  0x40   :  { %131 = vmatpush1.msra.mxu0 %v72_v30  ;;  %356 = vmatprep.subr.mxu1 %v228_v51 }
  0x41   :  { %132 = vmatprep.subr.mxu0 %v71_v31  ;;  %357 = vmatpush3.msra.mxu1 %v212_v52 }
  0x42   :  { %133 = vmatpush1.msra.mxu0 %v70_v32  ;;  %358 = vmatprep.subr.mxu1 %v227_v53 }
  0x43   :  { %134 = vmatprep.subr.mxu0 %v69_v33  ;;  %359 = vmatpush3.msra.mxu1 %v211_v54 }
  0x44   :  { %135 = vmatpush1.msra.mxu0 %v68_v34  ;;  %360 = vmatprep.subr.mxu1 %v226_v55 }
  0x45   :  { %136 = vmatprep.subr.mxu0 %v67_v35  ;;  %361 = vmatpush3.msra.mxu1 %v210_v56 }
  0x46   :  { %137 = vmatpush1.msra.mxu0 %v66_v36  ;;  %362 = vmatprep.subr.mxu1 %v225_v57 }
  0x47   :  { %138 = vmatprep.subr.mxu0 %v65_v37  ;;  %363 = vmatpush3.msra.mxu1 %v209_v58 }
  0x48   :  { %139 = vmatpush1.msra.mxu0 %v64_v38  ;;  %364 = vmatprep.subr.mxu1 %v224_v59 }
  0x49   :  { %173 = vmatmul.mubr.f32.vlgmr.msra.gmra.mxu0 %v62_v39  ;;  %365 = vmatpush3.msra.mxu1 %v208_v60  ;;  %v339_v39 = vld [vmem:[%s553_s4] ss:$0 sm:$0xff] }
  0x4a   :  { %178 = vmatprep.mubr.f32.mxu0 %v488_v0  ;;  %366 = vmatprep.subr.mxu1 %v223_v61  ;;  %v206_v0 = vld [vmem:[#allocation7 + $0x8] sm:$0xff] }
  0x4b   :  { %367 = vmatpush3.msra.mxu1 %v207_v62 }
  0x4c   :  { %368 = vmatprep.subr.mxu1 %v222_v63 }
  0x4d   :  { %179 = vmatmul.mubr.f32.gmra.mxu0 %v63_v40  ;;  %369 = vmatpush3.msra.mxu1 %v206_v0 }
  0x4e   :  { %370 = vmatprep.subr.mxu1 %v221_v1 }
  0x4f   :  { %371 = vmatpush3.msra.mxu1 %v205_v2 }
 0x109   :  { %v174_v10 = vpop.f32.mrf.mxu0 }
 0x10a   :  { %v175_v11 = vadd.f32 %v174_v10, %v101_v8 }
 0x10b   :  { %v176_v12 = vpop.f32.mrf.mxu0 }
 0x10c   :  { %v189_v13 = vmul.f32 0.70710677, %v175_v11  ;;  %v177_v14 = vadd.f32 %v176_v12, %v105_v9  ;;  %v185_v28 = vmul.f32 0.5, %v175_v11 }
 0x10d   :  { %v180_v15 = vpop.f32.mrf.mxu0 }
 0x10e   :  { %387 = verf.f32 %v189_v13  ;;  %v190_v16 = vmul.f32 0.70710677, %v177_v14  ;;  %v181_v17 = vadd.f32 %v180_v15, %v101_v8  ;;  %v186_v25 = vmul.f32 0.5, %v177_v14 }
 0x10f   :  { %v182_v18 = vpop.f32.mrf.mxu0 }
 0x110   :  { %389 = verf.f32 %v190_v16  ;;  %v191_v19 = vmul.f32 0.70710677, %v181_v17  ;;  %v183_v20 = vadd.f32 %v182_v18, %v105_v9  ;;  %v187_v35 = vmul.f32 0.5, %v181_v17 }
 0x112   :  { %391 = verf.f32 %v191_v19  ;;  %v192_v21 = vmul.f32 0.70710677, %v183_v20  ;;  %v188_v33 = vmul.f32 0.5, %v183_v20 }
 0x114   :  { %393 = verf.f32 %v192_v21 }
 0x11b   :  { %v388_v22 = vpop.eup %387 }
 0x11c   :  { %v197_v24 = vadd.f32 1.0, %v388_v22 }
 0x11d   :  { %v390_v23 = vpop.eup %389 }
 0x11e   :  { %v198_v26 = vadd.f32 1.0, %v390_v23  ;;  %v201_v31 = vmul.f32 %v197_v24, %v185_v28 }
 0x11f   :  { %v392_v27 = vpop.eup %391 }
 0x120   :  { %v202_v29 = vmul.f32 %v198_v26, %v186_v25  ;;  %v199_v32 = vadd.f32 1.0, %v392_v27 }
 0x121   :  { %v394_v30 = vpop.eup %393 }
 0x122   :  { %308 = vmatprep.mubr.f32.mxu1 %v202_v29  ;;  %v200_v34 = vadd.f32 1.0, %v394_v30  ;;  %v203_v37 = vmul.f32 %v199_v32, %v187_v35 }
 0x123   :  { %309 = vmatmul.mubr.f32.vlgmr.msra.gmra.mxu1 %v201_v31 }
 0x124   :  { %v204_v36 = vmul.f32 %v200_v34, %v188_v33 }
 0x126   :  { %313 = vmatprep.mubr.f32.mxu1 %v204_v36 }
 0x127   :  { %314 = vmatmul.mubr.f32.gmra.mxu1 %v203_v37 }
 0x1e3   :  { %v372_v38 = vpop.f32.mrf.mxu1 }
 0x1e5   :  { %v373_v40 = vpop.f32.mrf.mxu1 }
 0x1e6   :  { %v374_v41 = vadd.f32 %v373_v40, %v372_v38 }
 0x1e7   :  { %v375_v42 = vpop.f32.mrf.mxu1 }
 0x1e8   :  { %v311_v43 = vadd.f32 %v374_v41, %v339_v39 }
 0x1e9   :  { %v376_v44 = vpop.f32.mrf.mxu1 }
 0x1ea   :  { %319 = vst [vmem:[#allocation8] sm:$0xff] %v311_v43  ;;  %v377_v45 = vadd.f32 %v376_v44, %v375_v42 }
 0x1ec   :  { %v316_v46 = vadd.f32 %v377_v45, %v339_v39 }
 0x1ee   :  { %320 = vst [vmem:[#allocation8 + $0x8] sm:$0xff] %v316_v46 }
 0x1ef   :  { %466 = shalt.err (!%p463_p5)
}
 0x1f0   :  { %332 = dma.vmem_to_hbm [thread:$0]  %s327_s13, 256, %s554_s5, [#allocation4], %s485_s28, %s485_s28, %s486_s29  }
 0x1f1   :  { %479 = dma.done.wait [#allocation4], 256  }
 0x1f2   :  { %480 = vsyncadd [#allocation4], 4294967040 }
 0x1f3   :  { %336 = vsyncpa [#allocation3], 1 }
 0x1f4   :  { %337 = vsyncpa [#allocation6], 1 }
 0x1f5   :  { %338 = vsyncpa [#allocation4], 1 }

// kernel: _mlp_pallas_impl.1
= control target key start
LH: loop header
LB: loop body
LE: loop exit
PB: predicated region body
PF: predicated region fallthrough
CT: control target
= control target key end

     0   :  { %10 = vsyncpa [#allocation3], 0  ;;  %s549_s0 = inlined_call_operand.hbm [shape: f32[16,128], index: 0, kind: input, shape index: {}]   ;;  %s550_s1 = inlined_call_operand.hbm [shape: f32[128,256], index: 1, kind: input, shape index: {}]   ;;  %s551_s2 = inlined_call_operand.vmem [shape: f32[1,256], index: 2, kind: input, shape index: {}]   ;;  %s552_s3 = inlined_call_operand.hbm [shape: f32[256,128], index: 3, kind: input, shape index: {}]   ;;  %s553_s4 = inlined_call_operand.vmem [shape: f32[1,128], index: 4, kind: input, shape index: {}]   ;;  %s554_s5 = inlined_call_operand.hbm [shape: f32[16,128], index: 5, kind: output, shape index: {}]  }
   0x1   :  { %11 = vsyncpa [#allocation6], 0 }
   0x2   :  { %12 = vsyncpa [#allocation4], 0  ;;  %s481_s18 = smov [#allocation5]  }
   0x3   :  { %s30_s19 = sshll.u32 %s481_s18, 4  ;;  %s31_s19 = int_to_ptr.vmem [resolvable:$true] %s30_s19 }
   0x4   :  { %s403_s20 = scalar_lea.vmem %s31_s19, 4096  ;;  %p408_p1 = scmp.lt.s32.totalorder %s31_s19, %s31_s19 }
   0x5   :  { %p404_p0 = scmp.ne.s32.totalorder %s31_s19, %s403_s20  ;;  %p409_p2 = scmp.lt.s32.totalorder %s403_s20, %s403_s20 }
   0x7   :  { %p410_p3 = por %p409_p2, %p408_p1 }
   0x9   :  { %p411_p4 = pnand %p410_p3, %p404_p0 }
   0xb   :  { %414 = shalt.err (!%p411_p4)
}
   0xc   :  { %s482_s21 = smov 256   ;;  %s483_s22 = smov 16  }
   0xd   :  { %36 = dma.hbm_to_vmem [thread:$0]  %s550_s1, 4096, %s31_s19, [#allocation6], %s482_s21, %s482_s21, %s483_s22  }
   0xe   :  { %s484_s25 = smov [#allocation2]  }
   0xf   :  { %s18_s26 = sshll.u32 %s484_s25, 4  ;;  %s19_s26 = int_to_ptr.vmem [resolvable:$true] %s18_s26 }
  0x10   :  { %s423_s27 = scalar_lea.vmem %s19_s26, 256  ;;  %p428_p6 = scmp.lt.s32.totalorder %s19_s26, %s19_s26 }
  0x11   :  { %p424_p5 = scmp.ne.s32.totalorder %s19_s26, %s423_s27  ;;  %p429_p7 = scmp.lt.s32.totalorder %s423_s27, %s423_s27 }
  0x13   :  { %p430_p8 = por %p429_p7, %p428_p6 }
  0x15   :  { %p431_p9 = pnand %p430_p8, %p424_p5 }
  0x17   :  { %434 = shalt.err (!%p431_p9)
}
  0x18   :  { %s485_s28 = smov 128   ;;  %s486_s29 = smov 8  }
  0x19   :  { %24 = dma.hbm_to_vmem [thread:$0]  %s549_s0, 256, %s19_s26, [#allocation3], %s485_s28, %s485_s28, %s486_s29  }
  0x1a   :  { %s487_s1 = smov [#allocation7]  }
  0x1b   :  { %s44_s7 = sshll.u32 %s487_s1, 4  ;;  %s45_s7 = int_to_ptr.vmem [resolvable:$true] %s44_s7 }
  0x1c   :  { %s443_s8 = scalar_lea.vmem %s45_s7, 4096  ;;  %p448_p11 = scmp.lt.s32.totalorder %s45_s7, %s45_s7 }
  0x1d   :  { %p444_p10 = scmp.ne.s32.totalorder %s45_s7, %s443_s8  ;;  %p449_p12 = scmp.lt.s32.totalorder %s443_s8, %s443_s8 }
  0x1f   :  { %p450_p13 = por %p449_p12, %p448_p11 }
  0x21   :  { %p451_p0 = pnand %p450_p13, %p444_p10 }
  0x23   :  { %454 = shalt.err (!%p451_p0)
}
  0x24   :  { %50 = dma.hbm_to_vmem [thread:$0]  %s552_s3, 4096, %s45_s7, [#allocation6], %s485_s28, %s485_s28, %s486_s29  }
  0x25   :  { %475 = dma.done.wait [#allocation3], 256  }
  0x26   :  { %476 = vsyncadd [#allocation3], 4294967040 }
  0x27   :  { %477 = dma.done.wait [#allocation6], 8192  }
  0x28   :  { %478 = vsyncadd [#allocation6], 4294959104  ;;  %v488_v0 = vmov 0.0   ;;  %v95_v1 = vld [vmem:[#allocation5 + $0xf8] sm:$0xff]  ;;  %v94_v2 = vld [vmem:[#allocation5 + $0xf0] sm:$0xff]  ;;  %s489_s12 = smov [#allocation8]  }
  0x29   :  { %172 = vmatprep.mubr.f32.mxu0 %v488_v0  ;;  %v93_v3 = vld [vmem:[#allocation5 + $0xe8] sm:$0xff]  ;;  %108 = vmatprep.subr.mxu0 %v95_v1  ;;  %v92_v4 = vld [vmem:[#allocation5 + $0xe0] sm:$0xff]  ;;  %v91_v5 = vld [vmem:[#allocation5 + $0xd8] sm:$0xff]  ;;  %s326_s13 = sshll.u32 %s489_s12, 4  ;;  %s327_s13 = int_to_ptr.vmem [resolvable:$true] %s326_s13 }
  0x2a   :  { %109 = vmatpush1.msra.mxu0 %v94_v2  ;;  %v90_v6 = vld [vmem:[#allocation5 + $0xd0] sm:$0xff]  ;;  %v89_v7 = vld [vmem:[#allocation5 + $0xc8] sm:$0xff]  ;;  %v88_v8 = vld [vmem:[#allocation5 + $0xc0] sm:$0xff]  ;;  %s455_s14 = scalar_lea.vmem %s327_s13, 256  ;;  %p460_p2 = scmp.lt.s32.totalorder %s327_s13, %s327_s13 }
  0x2b   :  { %110 = vmatprep.subr.mxu0 %v93_v3  ;;  %v87_v9 = vld [vmem:[#allocation5 + $0xb8] sm:$0xff]  ;;  %v86_v10 = vld [vmem:[#allocation5 + $0xb0] sm:$0xff]  ;;  %v85_v11 = vld [vmem:[#allocation5 + $0xa8] sm:$0xff]  ;;  %v98_v3 = vlaneseq  ;;  %p456_p1 = scmp.ne.s32.totalorder %s327_s13, %s455_s14  ;;  %p461_p3 = scmp.lt.s32.totalorder %s455_s14, %s455_s14 }
  0x2c   :  { %111 = vmatpush1.msra.mxu0 %v92_v4  ;;  %v84_v12 = vld [vmem:[#allocation5 + $0xa0] sm:$0xff]  ;;  %v83_v13 = vld [vmem:[#allocation5 + $0x98] sm:$0xff]  ;;  %v82_v14 = vld [vmem:[#allocation5 + $0x90] sm:$0xff] }
  0x2d   :  { %112 = vmatprep.subr.mxu0 %v91_v5  ;;  %v236_v15 = vld [vmem:[#allocation7 + $0xf8] sm:$0xff]  ;;  %v81_v17 = vld [vmem:[#allocation5 + $0x88] sm:$0xff]  ;;  %v235_v18 = vld [vmem:[#allocation7 + $0xf0] sm:$0xff]  ;;  %v99_v4 = vshrl.u32 %v98_v3, 7  ;;  %p462_p4 = por %p461_p3, %p460_p2 }
  0x2e   :  { %113 = vmatpush1.msra.mxu0 %v90_v6  ;;  %v220_v16 = vld [vmem:[#allocation7 + $0x78] sm:$0xff]  ;;  %340 = vmatprep.subr.mxu1 %v236_v15  ;;  %v219_v19 = vld [vmem:[#allocation7 + $0x70] sm:$0xff]  ;;  %v80_v20 = vld [vmem:[#allocation5 + $0x80] sm:$0xff] }
  0x2f   :  { %114 = vmatprep.subr.mxu0 %v89_v7  ;;  %341 = vmatpush3.msra.mxu1 %v220_v16  ;;  %v234_v21 = vld [vmem:[#allocation7 + $0xe8] sm:$0xff]  ;;  %v79_v22 = vld [vmem:[#allocation5 + $0x78] sm:$0xff]  ;;  %v78_v24 = vld [vmem:[#allocation5 + $0x70] sm:$0xff]  ;;  %v100_v5 = vsub.s32 0, %v99_v4  ;;  %v104_v7 = vsub.s32 1, %v99_v4  ;;  %p463_p5 = pnand %p462_p4, %p456_p1 }
  0x30   :  { %115 = vmatpush1.msra.mxu0 %v88_v8  ;;  %342 = vmatprep.subr.mxu1 %v235_v18  ;;  %v218_v23 = vld [vmem:[#allocation7 + $0x68] sm:$0xff]  ;;  %v76_v26 = vld [vmem:[#allocation5 + $0x60] sm:$0xff]  ;;  %v75_v27 = vld [vmem:[#allocation5 + $0x58] sm:$0xff] }
  0x31   :  { %116 = vmatprep.subr.mxu0 %v87_v9  ;;  %343 = vmatpush3.msra.mxu1 %v219_v19  ;;  %v77_v25 = vld [vmem:[#allocation5 + $0x68] sm:$0xff]  ;;  %v74_v28 = vld [vmem:[#allocation5 + $0x50] sm:$0xff]  ;;  %v72_v30 = vld [vmem:[#allocation5 + $0x40] sm:$0xff] }
  0x32   :  { %117 = vmatpush1.msra.mxu0 %v86_v10  ;;  %344 = vmatprep.subr.mxu1 %v234_v21  ;;  %v73_v29 = vld [vmem:[#allocation5 + $0x48] sm:$0xff]  ;;  %v71_v31 = vld [vmem:[#allocation5 + $0x38] sm:$0xff]  ;;  %v70_v32 = vld [vmem:[#allocation5 + $0x30] sm:$0xff] }
  0x33   :  { %118 = vmatprep.subr.mxu0 %v85_v11  ;;  %345 = vmatpush3.msra.mxu1 %v218_v23  ;;  %v69_v33 = vld [vmem:[#allocation5 + $0x28] sm:$0xff]  ;;  %v68_v34 = vld [vmem:[#allocation5 + $0x20] sm:$0xff]  ;;  %v67_v35 = vld [vmem:[#allocation5 + $0x18] sm:$0xff] }
  0x34   :  { %119 = vmatpush1.msra.mxu0 %v84_v12  ;;  %v66_v36 = vld [vmem:[#allocation5 + $0x10] sm:$0xff]  ;;  %v65_v37 = vld [vmem:[#allocation5 + $0x8] sm:$0xff]  ;;  %v64_v38 = vld [vmem:[#allocation5] sm:$0xff] }
  0x35   :  { %120 = vmatprep.subr.mxu0 %v83_v13  ;;  %v62_v39 = vld [vmem:[#allocation2] sm:$0xff]  ;;  %v63_v40 = vld [vmem:[#allocation2 + $0x8] sm:$0xff]  ;;  %v233_v41 = vld [vmem:[#allocation7 + $0xe0] sm:$0xff] }
  0x36   :  { %121 = vmatpush1.msra.mxu0 %v82_v14  ;;  %346 = vmatprep.subr.mxu1 %v233_v41  ;;  %v217_v42 = vld [vmem:[#allocation7 + $0x60] sm:$0xff]  ;;  %v232_v43 = vld [vmem:[#allocation7 + $0xd8] sm:$0xff]  ;;  %v231_v45 = vld [vmem:[#allocation7 + $0xd0] sm:$0xff] }
  0x37   :  { %122 = vmatprep.subr.mxu0 %v81_v17  ;;  %347 = vmatpush3.msra.mxu1 %v217_v42  ;;  %v216_v44 = vld [vmem:[#allocation7 + $0x58] sm:$0xff]  ;;  %v215_v46 = vld [vmem:[#allocation7 + $0x50] sm:$0xff]  ;;  %v230_v47 = vld [vmem:[#allocation7 + $0xc8] sm:$0xff] }
  0x38   :  { %123 = vmatpush1.msra.mxu0 %v80_v20  ;;  %348 = vmatprep.subr.mxu1 %v232_v43  ;;  %v214_v48 = vld [vmem:[#allocation7 + $0x48] sm:$0xff]  ;;  %v229_v49 = vld [vmem:[#allocation7 + $0xc0] sm:$0xff]  ;;  %v228_v51 = vld [vmem:[#allocation7 + $0xb8] sm:$0xff] }
  0x39   :  { %124 = vmatprep.subr.mxu0 %v79_v22  ;;  %349 = vmatpush3.msra.mxu1 %v216_v44  ;;  %v213_v50 = vld [vmem:[#allocation7 + $0x40] sm:$0xff]  ;;  %v212_v52 = vld [vmem:[#allocation7 + $0x38] sm:$0xff]  ;;  %v227_v53 = vld [vmem:[#allocation7 + $0xb0] sm:$0xff] }
  0x3a   :  { %125 = vmatpush1.msra.mxu0 %v78_v24  ;;  %350 = vmatprep.subr.mxu1 %v231_v45  ;;  %v211_v54 = vld [vmem:[#allocation7 + $0x30] sm:$0xff]  ;;  %v226_v55 = vld [vmem:[#allocation7 + $0xa8] sm:$0xff]  ;;  %v225_v57 = vld [vmem:[#allocation7 + $0xa0] sm:$0xff] }
  0x3b   :  { %126 = vmatprep.subr.mxu0 %v77_v25  ;;  %351 = vmatpush3.msra.mxu1 %v215_v46  ;;  %v210_v56 = vld [vmem:[#allocation7 + $0x28] sm:$0xff]  ;;  %v209_v58 = vld [vmem:[#allocation7 + $0x20] sm:$0xff]  ;;  %v224_v59 = vld [vmem:[#allocation7 + $0x98] sm:$0xff] }
  0x3c   :  { %127 = vmatpush1.msra.mxu0 %v76_v26  ;;  %352 = vmatprep.subr.mxu1 %v230_v47  ;;  %v208_v60 = vld [vmem:[#allocation7 + $0x18] sm:$0xff]  ;;  %v223_v61 = vld [vmem:[#allocation7 + $0x90] sm:$0xff]  ;;  %v222_v63 = vld [vmem:[#allocation7 + $0x88] sm:$0xff] }
  0x3d   :  { %128 = vmatprep.subr.mxu0 %v75_v27  ;;  %353 = vmatpush3.msra.mxu1 %v214_v48  ;;  %v207_v62 = vld [vmem:[#allocation7 + $0x10] sm:$0xff]  ;;  %v221_v1 = vld [vmem:[#allocation7 + $0x80] sm:$0xff] }
  0x3e   :  { %129 = vmatpush1.msra.mxu0 %v74_v28  ;;  %354 = vmatprep.subr.mxu1 %v229_v49  ;;  %v205_v2 = vld [vmem:[#allocation7] sm:$0xff]  ;;  %v96_v6 = vld [vmem:[%s551_s2] sm:$0x3] }
  0x3f   :  { %130 = vmatprep.subr.mxu0 %v73_v29  ;;  %355 = vmatpush3.msra.mxu1 %v213_v50  ;;  %v101_v8 = vrot.slane %v96_v6, %v100_v5  ;;  %v105_v9 = vrot.slane %v96_v6, %v104_v7 }
  0x40   :  { %131 = vmatpush1.msra.mxu0 %v72_v30  ;;  %356 = vmatprep.subr.mxu1 %v228_v51 }
  0x41   :  { %132 = vmatprep.subr.mxu0 %v71_v31  ;;  %357 = vmatpush3.msra.mxu1 %v212_v52 }
  0x42   :  { %133 = vmatpush1.msra.mxu0 %v70_v32  ;;  %358 = vmatprep.subr.mxu1 %v227_v53 }
  0x43   :  { %134 = vmatprep.subr.mxu0 %v69_v33  ;;  %359 = vmatpush3.msra.mxu1 %v211_v54 }
  0x44   :  { %135 = vmatpush1.msra.mxu0 %v68_v34  ;;  %360 = vmatprep.subr.mxu1 %v226_v55 }
  0x45   :  { %136 = vmatprep.subr.mxu0 %v67_v35  ;;  %361 = vmatpush3.msra.mxu1 %v210_v56 }
  0x46   :  { %137 = vmatpush1.msra.mxu0 %v66_v36  ;;  %362 = vmatprep.subr.mxu1 %v225_v57 }
  0x47   :  { %138 = vmatprep.subr.mxu0 %v65_v37  ;;  %363 = vmatpush3.msra.mxu1 %v209_v58 }
  0x48   :  { %139 = vmatpush1.msra.mxu0 %v64_v38  ;;  %364 = vmatprep.subr.mxu1 %v224_v59 }
  0x49   :  { %173 = vmatmul.mubr.f32.vlgmr.msra.gmra.mxu0 %v62_v39  ;;  %365 = vmatpush3.msra.mxu1 %v208_v60  ;;  %v339_v39 = vld [vmem:[%s553_s4] ss:$0 sm:$0xff] }
  0x4a   :  { %178 = vmatprep.mubr.f32.mxu0 %v488_v0  ;;  %366 = vmatprep.subr.mxu1 %v223_v61  ;;  %v206_v0 = vld [vmem:[#allocation7 + $0x8] sm:$0xff] }
  0x4b   :  { %367 = vmatpush3.msra.mxu1 %v207_v62 }
  0x4c   :  { %368 = vmatprep.subr.mxu1 %v222_v63 }
  0x4d   :  { %179 = vmatmul.mubr.f32.gmra.mxu0 %v63_v40  ;;  %369 = vmatpush3.msra.mxu1 %v206_v0 }
  0x4e   :  { %370 = vmatprep.subr.mxu1 %v221_v1 }
  0x4f   :  { %371 = vmatpush3.msra.mxu1 %v205_v2 }
 0x109   :  { %v174_v10 = vpop.f32.mrf.mxu0 }
 0x10a   :  { %v175_v11 = vadd.f32 %v174_v10, %v101_v8 }
 0x10b   :  { %v176_v12 = vpop.f32.mrf.mxu0 }
 0x10c   :  { %v189_v13 = vmul.f32 0.70710677, %v175_v11  ;;  %v177_v14 = vadd.f32 %v176_v12, %v105_v9  ;;  %v185_v28 = vmul.f32 0.5, %v175_v11 }
 0x10d   :  { %v180_v15 = vpop.f32.mrf.mxu0 }
 0x10e   :  { %387 = verf.f32 %v189_v13  ;;  %v190_v16 = vmul.f32 0.70710677, %v177_v14  ;;  %v181_v17 = vadd.f32 %v180_v15, %v101_v8  ;;  %v186_v25 = vmul.f32 0.5, %v177_v14 }
 0x10f   :  { %v182_v18 = vpop.f32.mrf.mxu0 }
 0x110   :  { %389 = verf.f32 %v190_v16  ;;  %v191_v19 = vmul.f32 0.70710677, %v181_v17  ;;  %v183_v20 = vadd.f32 %v182_v18, %v105_v9  ;;  %v187_v35 = vmul.f32 0.5, %v181_v17 }
 0x112   :  { %391 = verf.f32 %v191_v19  ;;  %v192_v21 = vmul.f32 0.70710677, %v183_v20  ;;  %v188_v33 = vmul.f32 0.5, %v183_v20 }
 0x114   :  { %393 = verf.f32 %v192_v21 }
 0x11b   :  { %v388_v22 = vpop.eup %387 }
 0x11c   :  { %v197_v24 = vadd.f32 1.0, %v388_v22 }
 0x11d   :  { %v390_v23 = vpop.eup %389 }
 0x11e   :  { %v198_v26 = vadd.f32 1.0, %v390_v23  ;;  %v201_v31 = vmul.f32 %v197_v24, %v185_v28 }
 0x11f   :  { %v392_v27 = vpop.eup %391 }
 0x120   :  { %v202_v29 = vmul.f32 %v198_v26, %v186_v25  ;;  %v199_v32 = vadd.f32 1.0, %v392_v27 }
 0x121   :  { %v394_v30 = vpop.eup %393 }
 0x122   :  { %308 = vmatprep.mubr.f32.mxu1 %v202_v29  ;;  %v200_v34 = vadd.f32 1.0, %v394_v30  ;;  %v203_v37 = vmul.f32 %v199_v32, %v187_v35 }
 0x123   :  { %309 = vmatmul.mubr.f32.vlgmr.msra.gmra.mxu1 %v201_v31 }
 0x124   :  { %v204_v36 = vmul.f32 %v200_v34, %v188_v33 }
 0x126   :  { %313 = vmatprep.mubr.f32.mxu1 %v204_v36 }
 0x127   :  { %314 = vmatmul.mubr.f32.gmra.mxu1 %v203_v37 }
 0x1e3   :  { %v372_v38 = vpop.f32.mrf.mxu1 }
 0x1e5   :  { %v373_v40 = vpop.f32.mrf.mxu1 }
 0x1e6   :  { %v374_v41 = vadd.f32 %v373_v40, %v372_v38 }
 0x1e7   :  { %v375_v42 = vpop.f32.mrf.mxu1 }
 0x1e8   :  { %v311_v43 = vadd.f32 %v374_v41, %v339_v39 }
 0x1e9   :  { %v376_v44 = vpop.f32.mrf.mxu1 }
 0x1ea   :  { %319 = vst [vmem:[#allocation8] sm:$0xff] %v311_v43  ;;  %v377_v45 = vadd.f32 %v376_v44, %v375_v42 }
 0x1ec   :  { %v316_v46 = vadd.f32 %v377_v45, %v339_v39 }
 0x1ee   :  { %320 = vst [vmem:[#allocation8 + $0x8] sm:$0xff] %v316_v46 }
 0x1ef   :  { %466 = shalt.err (!%p463_p5)
}
 0x1f0   :  { %332 = dma.vmem_to_hbm [thread:$0]  %s327_s13, 256, %s554_s5, [#allocation4], %s485_s28, %s485_s28, %s486_s29  }
 0x1f1   :  { %479 = dma.done.wait [#allocation4], 256  }
 0x1f2   :  { %480 = vsyncadd [#allocation4], 4294967040 }
 0x1f3   :  { %336 = vsyncpa [#allocation3], 1 }
 0x1f4   :  { %337 = vsyncpa [#allocation6], 1 }
 0x1f5   :  { %338 = vsyncpa [#allocation4], 1 }

</bundles_post_ra>
